<compile_context>
chip_gen: v6e
topology: v6e:2x2x1
jax: 0.10.0
libtpu: 0.0.40
codegen_flags: <defaults>
</compile_context>

<pallas_src>
import math

import jax
import jax.numpy as jnp
from jax.experimental import pallas as pl
from jax.experimental.pallas import tpu as pltpu


def _gabor_constraint_kernel(k_ref, o_ref, *, mu_lower, mu_upper,
                             sigma_lower, sigma_upper):
    # k_ref / o_ref: (2, num_filters), lane-dense (filters on the lane axis).
    # Row 0 = mu, row 1 = sigma.  Clamp each row with scalar immediates.
    o_ref[0:1, :] = jnp.clip(k_ref[0:1, :], mu_lower, mu_upper).astype(o_ref.dtype)
    o_ref[1:2, :] = jnp.clip(k_ref[1:2, :], sigma_lower, sigma_upper).astype(o_ref.dtype)


def gabor_constraint(kernel, kernel_size):
    """Pallas implementation of GaborConstraint.forward.

    Args:
      kernel: float array of shape (num_filters, 2)  [mu, sigma] per filter.
      kernel_size: python int, filter length in samples.
    Returns:
      array of shape (num_filters, 2) with clamped [mu, sigma].
    """
    mu_lower = 0.0
    mu_upper = math.pi
    sigma_lower = 4.0 * math.sqrt(2.0 * math.log(2.0)) / math.pi
    sigma_upper = kernel_size * math.sqrt(2.0 * math.log(2.0)) / math.pi

    num_filters, two = kernel.shape
    assert two == 2, "kernel must have shape (num_filters, 2)"

    body = lambda k_ref, o_ref: _gabor_constraint_kernel(
        k_ref, o_ref,
        mu_lower=mu_lower, mu_upper=mu_upper,
        sigma_lower=sigma_lower, sigma_upper=sigma_upper)

    # Lane-dense presentation: (2, num_filters) so filters map to lanes.
    kernel_t = kernel.T

    out_t = pl.pallas_call(
        body,
        out_shape=jax.ShapeDtypeStruct((2, num_filters), kernel.dtype),
        in_specs=[pl.BlockSpec(memory_space=pltpu.MemorySpace.VMEM)],
        out_specs=pl.BlockSpec(memory_space=pltpu.MemorySpace.VMEM),
        input_output_aliases={0: 0},
    )(kernel_t)

    return out_t.T


def gabor_constraint_ref(kernel, kernel_size):
    """Pure-JAX reference matching the PyTorch module exactly."""
    mu_lower = 0.0
    mu_upper = math.pi
    sigma_lower = 4.0 * math.sqrt(2.0 * math.log(2.0)) / math.pi
    sigma_upper = kernel_size * math.sqrt(2.0 * math.log(2.0)) / math.pi
    clipped_mu = jnp.clip(kernel[:, 0], mu_lower, mu_upper)
    clipped_sigma = jnp.clip(kernel[:, 1], sigma_lower, sigma_upper)
    return jnp.stack([clipped_mu, clipped_sigma], axis=1)


if __name__ == "__main__":
    # Deterministic synthetic "Gabor filter parameter" input:
    # 8 filters, each with (mu, sigma); kernel_size of the analysis filter = 16.
    num_filters = 8
    kernel_size = 16
    key = jax.random.PRNGKey(0)
    # Spread values so that some fall outside the clamp ranges on both sides.
    kernel = jax.random.uniform(
        key, (num_filters, 2), dtype=jnp.float32, minval=-2.0, maxval=8.0)

    out = gabor_constraint(kernel, kernel_size)
    out = jax.block_until_ready(out)

    ref = gabor_constraint_ref(kernel, kernel_size)
    assert out.shape == (num_filters, 2)
    assert jnp.allclose(out, ref, atol=1e-6), (out, ref)

    print("KERNEL_OK")
</pallas_src>

<mosaic_0001>
module attributes {stable_mosaic.version = 11 : i64} {
  func.func @_lambda_(%arg0: memref<2x8xf32, #tpu.memory_space<vmem>>, %arg1: memref<2x8xf32, #tpu.memory_space<vmem>>) attributes {dimension_semantics = [], scalar_prefetch = 0 : i64, scratch_operands = 0 : i64, tpu.core_type = #tpu.core_type<tc>} {
    %c0 = arith.constant 0 : index
    %c0_0 = arith.constant 0 : index
    %0 = vector.load %arg0[%c0, %c0_0] : memref<2x8xf32, #tpu.memory_space<vmem>>, vector<1x8xf32>
    %cst = arith.constant 0.000000e+00 : f32
    %cst_1 = arith.constant 3.14159274 : f32
    %1 = vector.broadcast %cst : f32 to vector<1x8xf32>
    %2 = arith.maximumf %1, %0 : vector<1x8xf32>
    %3 = vector.broadcast %cst_1 : f32 to vector<1x8xf32>
    %4 = arith.minimumf %3, %2 : vector<1x8xf32>
    %c0_2 = arith.constant 0 : index
    %c0_3 = arith.constant 0 : index
    %5 = vector.load %arg1[%c0_2, %c0_3] : memref<2x8xf32, #tpu.memory_space<vmem>>, vector<1x8xf32>
    tpu.vector_store %arg1[%c0_2, %c0_3], %4 {strides = array<i32>} : memref<2x8xf32, #tpu.memory_space<vmem>>, vector<1x8xf32>,
    %c1 = arith.constant 1 : index
    %c0_4 = arith.constant 0 : index
    %6 = vector.load %arg0[%c1, %c0_4] : memref<2x8xf32, #tpu.memory_space<vmem>>, vector<1x8xf32>
    %cst_5 = arith.constant 1.499125 : f32
    %cst_6 = arith.constant 5.996500e+00 : f32
    %7 = vector.broadcast %cst_5 : f32 to vector<1x8xf32>
    %8 = arith.maximumf %7, %6 : vector<1x8xf32>
    %9 = vector.broadcast %cst_6 : f32 to vector<1x8xf32>
    %10 = arith.minimumf %9, %8 : vector<1x8xf32>
    %c1_7 = arith.constant 1 : index
    %c0_8 = arith.constant 0 : index
    %11 = vector.load %arg1[%c1_7, %c0_8] : memref<2x8xf32, #tpu.memory_space<vmem>>, vector<1x8xf32>
    tpu.vector_store %arg1[%c1_7, %c0_8], %10 {strides = array<i32>} : memref<2x8xf32, #tpu.memory_space<vmem>>, vector<1x8xf32>,
    return
  }
}

</mosaic_0001>

<bundles_post_ra>
// kernel: tpu_custom_call.1
= control target key start
LH: loop header
LB: loop body
LE: loop exit
PB: predicated region body
PF: predicated region fallthrough
CT: control target
= control target key end

     0   :  { %6 = vsyncpa [#allocation3], 0  ;;  %s109_s0 = inlined_call_operand.hbm [shape: f32[2,8], index: 0, kind: input, shape index: {}, may-alias: {0,1}]   ;;  %s110_s1 = inlined_call_operand.hbm [shape: f32[2,8], index: 1, kind: output, shape index: {}, may-alias: {0,1}]  }
   0x1   :  { %7 = vsyncpa [#allocation4], 0  ;;  %s91_s6 = smov [#allocation2]  }
   0x2   :  { %s14_s7 = sshll.u32 %s91_s6, 4  ;;  %s15_s7 = int_to_ptr.vmem [resolvable:$true] %s14_s7 }
   0x3   :  { %s55_s8 = scalar_lea.vmem %s15_s7, 32  ;;  %p60_p1 = scmp.lt.s32.totalorder %s15_s7, %s15_s7 }
   0x4   :  { %p56_p0 = scmp.ne.s32.totalorder %s15_s7, %s55_s8  ;;  %p61_p2 = scmp.lt.s32.totalorder %s55_s8, %s55_s8 }
   0x6   :  { %p62_p3 = por %p61_p2, %p60_p1 }
   0x8   :  { %p63_p4 = pnand %p62_p3, %p56_p0 }
   0xa   :  { %66 = shalt.err (!%p63_p4)
}
   0xb   :  { %17 = dma.hbm_to_vmem [thread:$0]  %s109_s0, 32, %s15_s7, [#allocation3]  }
   0xc   :  { %87 = dma.done.wait [#allocation3], 32  }
   0xd   :  { %88 = vsyncadd [#allocation3], 4294967264  ;;  %v21_v0 = vld [vmem:[#allocation2] sm:$0x1]  ;;  %v26_v1 = vld [vmem:[#allocation2 + $0x1] sm:$0x1] }
   0xe   :  { %s92_s11 = smov [#allocation5]   ;;  %v22_v2 = vmax.f32 %v21_v0, 0.0  ;;  %v27_v3 = vmax.f32 %v26_v1, 1.499125  ;;  %vm24_vm0 = vcmask 57344  }
   0xf   :  { %s36_s12 = sshll.u32 %s92_s11, 4  ;;  %s37_s12 = int_to_ptr.vmem [resolvable:$true] %s36_s12 }
  0x10   :  { %v23_v4 = vmin.f32 %v22_v2, 3.1415927  ;;  %v28_v5 = vmin.f32 %v27_v3, 5.9965  ;;  %s67_s13 = scalar_lea.vmem %s37_s12, 32  ;;  %p72_p6 = scmp.lt.s32.totalorder %s37_s12, %s37_s12 }
  0x11   :  { %p68_p5 = scmp.ne.s32.totalorder %s37_s12, %s67_s13  ;;  %p73_p7 = scmp.lt.s32.totalorder %s67_s13, %s67_s13 }
  0x12   :  { %25 = vst.msk [vmem:[#allocation5] sm:$0x1] %vm24_vm0, %v23_v4  ;;  %29 = vst.msk [vmem:[#allocation5 + $0x1] sm:$0x1] %vm24_vm0, %v28_v5 }
  0x13   :  { %p74_p8 = por %p73_p7, %p72_p6 }
  0x15   :  { %p75_p9 = pnand %p74_p8, %p68_p5 }
  0x17   :  { %78 = shalt.err (!%p75_p9)
}
  0x18   :  { %39 = dma.vmem_to_hbm [thread:$0]  %s37_s12, 32, %s110_s1, [#allocation4]  }
  0x19   :  { %89 = dma.done.wait [#allocation4], 32  }
  0x1a   :  { %90 = vsyncadd [#allocation4], 4294967264 }
  0x1b   :  { %43 = vsyncpa [#allocation3], 1 }
  0x1c   :  { %44 = vsyncpa [#allocation4], 1 }

</bundles_post_ra>
